<compile_context>
chip_gen: v7x
topology: tpu7x:2x2x1
jax: 0.10.0
libtpu: 0.0.40
codegen_flags: <defaults>
</compile_context>

<pallas_src>
import jax
import jax.numpy as jnp
from jax.experimental import pallas as pl
from jax.experimental.pallas import tpu as pltpu


def _resolve_kernel_and_padding(kernel_size):
    """Mirrors SeparableConv2d.__init__ padding logic."""
    if isinstance(kernel_size, int):
        kh = kw = kernel_size
        pad_h = pad_w = kernel_size // 2
    else:
        kh, kw = kernel_size
        pad_h = kh // 2 if kh - 1 != 0 else 0
        pad_w = kw // 2 if kw - 1 != 0 else 0
    return kh, kw, pad_h, pad_w


def separable_conv2d_forward(x_nchw, dw_weight, pw_weight, kernel_size):
    """Fused depthwise(k, pad=k//2, groups=Cin, no bias) + pointwise(1x1, no bias).

    x_nchw:    (B, Cin, H, W) float32
    dw_weight: (Cin, 1, kh, kw)   -- PyTorch depthwise Conv2d weight (depth=1)
    pw_weight: (Cout, Cin, 1, 1)  -- PyTorch 1x1 Conv2d weight
    returns    (B, Cout, Ho, Wo) float32
    """
    B, Cin, H, W = x_nchw.shape
    Cout = pw_weight.shape[0]
    kh, kw, pad_h, pad_w = _resolve_kernel_and_padding(kernel_size)
    Ho = H + 2 * pad_h - kh + 1
    Wo = W + 2 * pad_w - kw + 1
    Hp = H + 2 * pad_h
    Wp = W + 2 * pad_w

    # Layout plumbing (plain JAX, outside the kernel): NCHW -> zero-padded NHWC
    # so channels sit in lanes and every tap is a plain shifted VMEM slice.
    x_nhwc = jnp.pad(
        jnp.transpose(x_nchw, (0, 2, 3, 1)),
        ((0, 0), (pad_h, pad_h), (pad_w, pad_w), (0, 0)),
    )
    dw_taps = jnp.transpose(dw_weight.reshape(Cin, kh * kw), (1, 0))  # (kh*kw, Cin)
    pw_mat = jnp.transpose(pw_weight.reshape(Cout, Cin), (1, 0))      # (Cin, Cout)

    def kernel(x_ref, dwk_ref, pw_ref, o_ref):
        # x_ref: (Hp, Wp, Cin) padded image block for this batch element.
        # Depthwise stencil on the VPU: k*k shifted slices, each scaled by its
        # per-channel tap weight (lane-aligned multiply), accumulated in f32.
        acc = None
        for t in range(kh * kw):
            dy, dx = divmod(t, kw)
            tap = x_ref[dy:dy + Ho, dx:dx + Wo, :] * dwk_ref[t]
            acc = tap if acc is None else acc + tap
        # Pointwise 1x1 conv on the MXU: (Ho*Wo, Cin) @ (Cin, Cout).
        y = acc.reshape(Ho * Wo, Cin)
        o_ref[...] = jnp.dot(y, pw_ref[...], preferred_element_type=jnp.float32)

    flops = 2 * B * Ho * Wo * Cin * (kh * kw + Cout)
    bytes_accessed = 4 * (B * Hp * Wp * Cin + B * Ho * Wo * Cout
                          + kh * kw * Cin + Cin * Cout)

    out = pl.pallas_call(
        kernel,
        out_shape=jax.ShapeDtypeStruct((B, Ho * Wo, Cout), jnp.float32),
        grid=(B,),
        in_specs=[
            # One padded image per grid step (batch dim squeezed out).
            pl.BlockSpec((None, Hp, Wp, Cin), lambda b: (b, 0, 0, 0)),
            # Small weights: constant index_map -> stay resident in VMEM.
            pl.BlockSpec((kh * kw, Cin), lambda b: (0, 0)),
            pl.BlockSpec((Cin, Cout), lambda b: (0, 0)),
        ],
        out_specs=pl.BlockSpec((None, Ho * Wo, Cout), lambda b: (b, 0, 0)),
        compiler_params=pltpu.CompilerParams(
            dimension_semantics=("parallel",)),
        cost_estimate=pl.CostEstimate(
            flops=flops, transcendentals=0, bytes_accessed=bytes_accessed),
    )(x_nhwc, dw_taps, pw_mat)

    # (B, Ho*Wo, Cout) -> (B, Cout, Ho, Wo) to match the PyTorch NCHW output.
    return jnp.transpose(out.reshape(B, Ho, Wo, Cout), (0, 3, 1, 2))


def _reference_forward(x_nchw, dw_weight, pw_weight, kernel_size):
    """Pure-JAX reference: grouped conv + 1x1 conv (NCHW), high precision."""
    kh, kw, pad_h, pad_w = _resolve_kernel_and_padding(kernel_size)
    cin = x_nchw.shape[1]
    y = jax.lax.conv_general_dilated(
        x_nchw, dw_weight, window_strides=(1, 1),
        padding=[(pad_h, pad_h), (pad_w, pad_w)],
        dimension_numbers=("NCHW", "OIHW", "NCHW"),
        feature_group_count=cin,
        precision=jax.lax.Precision.HIGHEST)
    z = jax.lax.conv_general_dilated(
        y, pw_weight, window_strides=(1, 1), padding=[(0, 0), (0, 0)],
        dimension_numbers=("NCHW", "OIHW", "NCHW"),
        precision=jax.lax.Precision.HIGHEST)
    return z


if __name__ == "__main__":
    key = jax.random.PRNGKey(0)
    kx, kd, kp = jax.random.split(key, 3)

    B, Cin, H, W = 2, 4, 16, 16
    Cout, K = 8, 3

    x = jax.random.normal(kx, (B, Cin, H, W), jnp.float32)
    dw_weight = jax.random.normal(kd, (Cin, 1, K, K), jnp.float32) / (K * K) ** 0.5
    pw_weight = jax.random.normal(kp, (Cout, Cin, 1, 1), jnp.float32) / Cin ** 0.5

    out = separable_conv2d_forward(x, dw_weight, pw_weight, K)
    out = jax.block_until_ready(out)

    ref = _reference_forward(x, dw_weight, pw_weight, K)
    assert out.shape == ref.shape == (B, Cout, H, W), (out.shape, ref.shape)
    max_err = float(jnp.max(jnp.abs(out - ref)))
    # Tolerance accounts for possible MXU f32 multi-pass rounding differences.
    assert jnp.allclose(out, ref, atol=1e-2, rtol=1e-2), max_err

    print("KERNEL_OK")
</pallas_src>

<mosaic_0001>
module attributes {stable_mosaic.version = 11 : i64} {
  func.func @kernel(%arg0: i32, %arg1: memref<1x18x18x4xf32, #tpu.memory_space<vmem>>, %arg2: memref<9x4xf32, #tpu.memory_space<vmem>>, %arg3: memref<4x8xf32, #tpu.memory_space<vmem>>, %arg4: memref<1x256x8xf32, #tpu.memory_space<vmem>>) attributes {dimension_semantics = [#tpu.dimension_semantics<parallel>], iteration_bounds = array<i64: 2>, scalar_prefetch = 0 : i64, scratch_operands = 0 : i64, tpu.core_type = #tpu.core_type<tc>, window_params = [{transform_indices = @transform_0, window_bounds = array<i64: 1, 18, 18, 4>}, {pipeline_mode = #tpu.pipeline_mode<synchronous>, transform_indices = @transform_1, window_bounds = array<i64: 9, 4>}, {pipeline_mode = #tpu.pipeline_mode<synchronous>, transform_indices = @transform_2, window_bounds = array<i64: 4, 8>}, {transform_indices = @transform_3, window_bounds = array<i64: 1, 256, 8>}]} {
    %c0 = arith.constant 0 : index
    %c0_0 = arith.constant 0 : index
    %c0_1 = arith.constant 0 : index
    %c0_2 = arith.constant 0 : index
    %0 = vector.load %arg1[%c0, %c0_0, %c0_1, %c0_2] : memref<1x18x18x4xf32, #tpu.memory_space<vmem>>, vector<1x16x16x4xf32>
    %1 = vector.shape_cast %0 : vector<1x16x16x4xf32> to vector<16x16x4xf32>
    %c0_3 = arith.constant 0 : index
    %c0_4 = arith.constant 0 : index
    %2 = vector.load %arg2[%c0_3, %c0_4] : memref<9x4xf32, #tpu.memory_space<vmem>>, vector<1x4xf32>
    %3 = vector.shape_cast %2 : vector<1x4xf32> to vector<4xf32>
    %4 = vector.shape_cast %3 : vector<4xf32> to vector<1x1x4xf32>
    %5 = vector.broadcast %4 : vector<1x1x4xf32> to vector<16x16x4xf32>
    %6 = arith.mulf %1, %5 : vector<16x16x4xf32>
    %c0_5 = arith.constant 0 : index
    %c0_6 = arith.constant 0 : index
    %c1 = arith.constant 1 : index
    %c0_7 = arith.constant 0 : index
    %7 = vector.load %arg1[%c0_5, %c0_6, %c1, %c0_7] : memref<1x18x18x4xf32, #tpu.memory_space<vmem>>, vector<1x16x16x4xf32>
    %8 = vector.shape_cast %7 : vector<1x16x16x4xf32> to vector<16x16x4xf32>
    %c1_8 = arith.constant 1 : index
    %c0_9 = arith.constant 0 : index
    %9 = vector.load %arg2[%c1_8, %c0_9] : memref<9x4xf32, #tpu.memory_space<vmem>>, vector<1x4xf32>
    %10 = vector.shape_cast %9 : vector<1x4xf32> to vector<4xf32>
    %11 = vector.shape_cast %10 : vector<4xf32> to vector<1x1x4xf32>
    %12 = vector.broadcast %11 : vector<1x1x4xf32> to vector<16x16x4xf32>
    %13 = arith.mulf %8, %12 : vector<16x16x4xf32>
    %14 = arith.addf %6, %13 : vector<16x16x4xf32>
    %c0_10 = arith.constant 0 : index
    %c0_11 = arith.constant 0 : index
    %c2 = arith.constant 2 : index
    %c0_12 = arith.constant 0 : index
    %15 = vector.load %arg1[%c0_10, %c0_11, %c2, %c0_12] : memref<1x18x18x4xf32, #tpu.memory_space<vmem>>, vector<1x16x16x4xf32>
    %16 = vector.shape_cast %15 : vector<1x16x16x4xf32> to vector<16x16x4xf32>
    %c2_13 = arith.constant 2 : index
    %c0_14 = arith.constant 0 : index
    %17 = vector.load %arg2[%c2_13, %c0_14] : memref<9x4xf32, #tpu.memory_space<vmem>>, vector<1x4xf32>
    %18 = vector.shape_cast %17 : vector<1x4xf32> to vector<4xf32>
    %19 = vector.shape_cast %18 : vector<4xf32> to vector<1x1x4xf32>
    %20 = vector.broadcast %19 : vector<1x1x4xf32> to vector<16x16x4xf32>
    %21 = arith.mulf %16, %20 : vector<16x16x4xf32>
    %22 = arith.addf %14, %21 : vector<16x16x4xf32>
    %c0_15 = arith.constant 0 : index
    %c1_16 = arith.constant 1 : index
    %c0_17 = arith.constant 0 : index
    %c0_18 = arith.constant 0 : index
    %23 = vector.load %arg1[%c0_15, %c1_16, %c0_17, %c0_18] : memref<1x18x18x4xf32, #tpu.memory_space<vmem>>, vector<1x16x16x4xf32>
    %24 = vector.shape_cast %23 : vector<1x16x16x4xf32> to vector<16x16x4xf32>
    %c3 = arith.constant 3 : index
    %c0_19 = arith.constant 0 : index
    %25 = vector.load %arg2[%c3, %c0_19] : memref<9x4xf32, #tpu.memory_space<vmem>>, vector<1x4xf32>
    %26 = vector.shape_cast %25 : vector<1x4xf32> to vector<4xf32>
    %27 = vector.shape_cast %26 : vector<4xf32> to vector<1x1x4xf32>
    %28 = vector.broadcast %27 : vector<1x1x4xf32> to vector<16x16x4xf32>
    %29 = arith.mulf %24, %28 : vector<16x16x4xf32>
    %30 = arith.addf %22, %29 : vector<16x16x4xf32>
    %c0_20 = arith.constant 0 : index
    %c1_21 = arith.constant 1 : index
    %c1_22 = arith.constant 1 : index
    %c0_23 = arith.constant 0 : index
    %31 = vector.load %arg1[%c0_20, %c1_21, %c1_22, %c0_23] : memref<1x18x18x4xf32, #tpu.memory_space<vmem>>, vector<1x16x16x4xf32>
    %32 = vector.shape_cast %31 : vector<1x16x16x4xf32> to vector<16x16x4xf32>
    %c4 = arith.constant 4 : index
    %c0_24 = arith.constant 0 : index
    %33 = vector.load %arg2[%c4, %c0_24] : memref<9x4xf32, #tpu.memory_space<vmem>>, vector<1x4xf32>
    %34 = vector.shape_cast %33 : vector<1x4xf32> to vector<4xf32>
    %35 = vector.shape_cast %34 : vector<4xf32> to vector<1x1x4xf32>
    %36 = vector.broadcast %35 : vector<1x1x4xf32> to vector<16x16x4xf32>
    %37 = arith.mulf %32, %36 : vector<16x16x4xf32>
    %38 = arith.addf %30, %37 : vector<16x16x4xf32>
    %c0_25 = arith.constant 0 : index
    %c1_26 = arith.constant 1 : index
    %c2_27 = arith.constant 2 : index
    %c0_28 = arith.constant 0 : index
    %39 = vector.load %arg1[%c0_25, %c1_26, %c2_27, %c0_28] : memref<1x18x18x4xf32, #tpu.memory_space<vmem>>, vector<1x16x16x4xf32>
    %40 = vector.shape_cast %39 : vector<1x16x16x4xf32> to vector<16x16x4xf32>
    %c5 = arith.constant 5 : index
    %c0_29 = arith.constant 0 : index
    %41 = vector.load %arg2[%c5, %c0_29] : memref<9x4xf32, #tpu.memory_space<vmem>>, vector<1x4xf32>
    %42 = vector.shape_cast %41 : vector<1x4xf32> to vector<4xf32>
    %43 = vector.shape_cast %42 : vector<4xf32> to vector<1x1x4xf32>
    %44 = vector.broadcast %43 : vector<1x1x4xf32> to vector<16x16x4xf32>
    %45 = arith.mulf %40, %44 : vector<16x16x4xf32>
    %46 = arith.addf %38, %45 : vector<16x16x4xf32>
    %c0_30 = arith.constant 0 : index
    %c2_31 = arith.constant 2 : index
    %c0_32 = arith.constant 0 : index
    %c0_33 = arith.constant 0 : index
    %47 = vector.load %arg1[%c0_30, %c2_31, %c0_32, %c0_33] : memref<1x18x18x4xf32, #tpu.memory_space<vmem>>, vector<1x16x16x4xf32>
    %48 = vector.shape_cast %47 : vector<1x16x16x4xf32> to vector<16x16x4xf32>
    %c6 = arith.constant 6 : index
    %c0_34 = arith.constant 0 : index
    %49 = vector.load %arg2[%c6, %c0_34] : memref<9x4xf32, #tpu.memory_space<vmem>>, vector<1x4xf32>
    %50 = vector.shape_cast %49 : vector<1x4xf32> to vector<4xf32>
    %51 = vector.shape_cast %50 : vector<4xf32> to vector<1x1x4xf32>
    %52 = vector.broadcast %51 : vector<1x1x4xf32> to vector<16x16x4xf32>
    %53 = arith.mulf %48, %52 : vector<16x16x4xf32>
    %54 = arith.addf %46, %53 : vector<16x16x4xf32>
    %c0_35 = arith.constant 0 : index
    %c2_36 = arith.constant 2 : index
    %c1_37 = arith.constant 1 : index
    %c0_38 = arith.constant 0 : index
    %55 = vector.load %arg1[%c0_35, %c2_36, %c1_37, %c0_38] : memref<1x18x18x4xf32, #tpu.memory_space<vmem>>, vector<1x16x16x4xf32>
    %56 = vector.shape_cast %55 : vector<1x16x16x4xf32> to vector<16x16x4xf32>
    %c7 = arith.constant 7 : index
    %c0_39 = arith.constant 0 : index
    %57 = vector.load %arg2[%c7, %c0_39] : memref<9x4xf32, #tpu.memory_space<vmem>>, vector<1x4xf32>
    %58 = vector.shape_cast %57 : vector<1x4xf32> to vector<4xf32>
    %59 = vector.shape_cast %58 : vector<4xf32> to vector<1x1x4xf32>
    %60 = vector.broadcast %59 : vector<1x1x4xf32> to vector<16x16x4xf32>
    %61 = arith.mulf %56, %60 : vector<16x16x4xf32>
    %62 = arith.addf %54, %61 : vector<16x16x4xf32>
    %c0_40 = arith.constant 0 : index
    %c2_41 = arith.constant 2 : index
    %c2_42 = arith.constant 2 : index
    %c0_43 = arith.constant 0 : index
    %63 = vector.load %arg1[%c0_40, %c2_41, %c2_42, %c0_43] : memref<1x18x18x4xf32, #tpu.memory_space<vmem>>, vector<1x16x16x4xf32>
    %64 = vector.shape_cast %63 : vector<1x16x16x4xf32> to vector<16x16x4xf32>
    %c8 = arith.constant 8 : index
    %c0_44 = arith.constant 0 : index
    %65 = vector.load %arg2[%c8, %c0_44] : memref<9x4xf32, #tpu.memory_space<vmem>>, vector<1x4xf32>
    %66 = vector.shape_cast %65 : vector<1x4xf32> to vector<4xf32>
    %67 = vector.shape_cast %66 : vector<4xf32> to vector<1x1x4xf32>
    %68 = vector.broadcast %67 : vector<1x1x4xf32> to vector<16x16x4xf32>
    %69 = arith.mulf %64, %68 : vector<16x16x4xf32>
    %70 = arith.addf %62, %69 : vector<16x16x4xf32>
    %71 = vector.shape_cast %70 : vector<16x16x4xf32> to vector<256x4xf32>
    %c0_45 = arith.constant 0 : index
    %c0_46 = arith.constant 0 : index
    %72 = vector.load %arg3[%c0_45, %c0_46] : memref<4x8xf32, #tpu.memory_space<vmem>>, vector<4x8xf32>
    %cst = arith.constant dense<0.000000e+00> : vector<256x8xf32>
    %73 = tpu.matmul %71, %72, %cst {dimension_numbers = #tpu.dot_dimension_numbers<[1], [0], [0], [1], [0, 0, 1, 1], [], []>} : vector<256x4xf32>, vector<4x8xf32>, vector<256x8xf32> -> vector<256x8xf32>
    %c0_47 = arith.constant 0 : index
    %c0_48 = arith.constant 0 : index
    %c0_49 = arith.constant 0 : index
    %74 = vector.load %arg4[%c0_47, %c0_48, %c0_49] : memref<1x256x8xf32, #tpu.memory_space<vmem>>, vector<1x256x8xf32>
    %75 = vector.shape_cast %74 : vector<1x256x8xf32> to vector<256x8xf32>
    %76 = vector.shape_cast %73 : vector<256x8xf32> to vector<1x256x8xf32>
    tpu.vector_store %arg4[%c0_47, %c0_48, %c0_49], %76 {strides = array<i32>} : memref<1x256x8xf32, #tpu.memory_space<vmem>>, vector<1x256x8xf32>,
    return
  }
  func.func @transform_0(%arg0: i32) -> (i32, i32, i32, i32) {
    %c0_i32 = arith.constant 0 : i32
    %c0_i32_0 = arith.constant 0 : i32
    %c0_i32_1 = arith.constant 0 : i32
    %c0_i32_2 = arith.constant 0 : i32
    return %arg0, %c0_i32, %c0_i32_0, %c0_i32_1 : i32, i32, i32, i32
  }
  func.func @transform_1(%arg0: i32) -> (i32, i32) {
    %c0_i32 = arith.constant 0 : i32
    %c0_i32_0 = arith.constant 0 : i32
    %c0_i32_1 = arith.constant 0 : i32
    return %c0_i32, %c0_i32_0 : i32, i32
  }
  func.func @transform_2(%arg0: i32) -> (i32, i32) {
    %c0_i32 = arith.constant 0 : i32
    %c0_i32_0 = arith.constant 0 : i32
    %c0_i32_1 = arith.constant 0 : i32
    return %c0_i32, %c0_i32_0 : i32, i32
  }
  func.func @transform_3(%arg0: i32) -> (i32, i32, i32) {
    %c0_i32 = arith.constant 0 : i32
    %c0_i32_0 = arith.constant 0 : i32
    %c0_i32_1 = arith.constant 0 : i32
    return %arg0, %c0_i32, %c0_i32_0 : i32, i32, i32
  }
}

</mosaic_0001>

<bundles_post_ra>
// kernel: tpu_custom_call.1
= control target key start
LH: loop header
LB: loop body
LE: loop exit
PB: predicated region body
PF: predicated region fallthrough
CT: control target
= control target key end

     0   :  { %s1841_s12 = smov 0   ;;  %s2902_s0 = inlined_call_operand.vmem [shape: f32[2,18,18,4], index: 0, kind: input, shape index: {}]   ;;  %s2903_s1 = inlined_call_operand.vmem [shape: f32[9,4], index: 1, kind: input, shape index: {}]   ;;  %s2904_s2 = inlined_call_operand.vmem [shape: f32[4,8], index: 2, kind: input, shape index: {}]   ;;  %s2905_s3 = inlined_call_operand.vmem [shape: f32[2,256,8], index: 3, kind: output, shape index: {}]  }
   0x1 LB: > { %s1465_s13 = sadd.s32 4294967295, %s1819_s12   ;;  %p1469_p0 = scmp.ge.s32.totalorder %s1819_s12, 1  ;;  %s1819_s12 = sphi %s1841_s12, %s13_s12  }
   0x2   : > { %p137_p1 = scmp.lt.s32.totalorder %s1819_s12, 3 }
   0x4   : > { %p138_p2 = pnand %p1469_p0, %p137_p1 }
   0x5   : > { %v1050_v0 = vld [vmem:[%s2904_s2] sm:$0xf] (!%p138_p2)  ;;  %vm1148_vm0 = vcmask (!%p138_p2), 1043456   ;;  %p161_p3 = scmp.lt.s32.totalorder (!%p138_p2), %s1465_s13, 1  ;;  %v1883_v5 = vld [vmem:[%s2903_s1 + $0x4] ss:$0 sm:$0xff] (!%p138_p2) }
   0x6   : > { %141 = sbr.rel (%p138_p2) target bundleno = 377 (0x179), region = 32  ;;  %1743 = vmatprep.subr.msk.mxu0 (!%p138_p2), %vm1148_vm0, %v1050_v0  ;;  %1793 = vmatprep.subr.msk.mxu1 (!%p138_p2), %vm1148_vm0, %v1050_v0  ;;  %v1858_v1 = vld [vmem:[%s2903_s1] ss:$0 sm:$0xff] (!%p138_p2)  ;;  %v1863_v2 = vld [vmem:[%s2903_s1 + $0x1] ss:$0 sm:$0xff] (!%p138_p2)  ;;  %vm1051_vm1 = vcmask (!%p138_p2), 31744  }
   0x7   : > { %1744 = vmatpush3.msk.msra.mxu0 (!%p138_p2), %vm1148_vm0, %v1050_v0  ;;  %1794 = vmatpush3.msk.msra.mxu1 (!%p138_p2), %vm1148_vm0, %v1050_v0  ;;  %v1868_v3 = vld [vmem:[%s2903_s1 + $0x2] ss:$0 sm:$0xff] (!%p138_p2)  ;;  %v1878_v4 = vld [vmem:[%s2903_s1 + $0x3] ss:$0 sm:$0xff] (!%p138_p2)  ;;  %v1888_v6 = vld [vmem:[%s2903_s1 + $0x5] ss:$0 sm:$0xff] (!%p138_p2) }
   0x8   : > { %v1896_v10 = vld [vmem:[%s2903_s1 + $0x6] ss:$0 sm:$0xff] (!%p138_p2)  ;;  %v1905_v15 = vld [vmem:[%s2903_s1 + $0x7] ss:$0 sm:$0xff] (!%p138_p2)  ;;  %v1910_v16 = vld [vmem:[%s2903_s1 + $0x8] ss:$0 sm:$0xff] (!%p138_p2) }
   0x9   : > { %vm1377_vm2 = vcmask (!%p138_p2), 64512  }
   0xd   : > { %s2907_s13 = smov (!%p161_p3, %s1465_s13), 1 }
   0xe   : > { %s1795_s16 = smul.u32 432, %s2907_s13  ;;  %s1709_s5 = sshll.u32 %s2907_s13, 8 }
   0xf   : > { %s2833_s8 = scalar_lea.vmem %s2905_s3, %s1709_s5 }
  0x10   : > { %s1873_s25 = scalar_lea.vmem %s2902_s0, %s1795_s16 }
  0x11   : > { %v171_v7 = vld [vmem:[%s1873_s25] sm:$0xff]  ;;  %v1476_v14 = vld [vmem:[%s1873_s25 + $0x18] sm:$0xff]  ;;  %v1917_v19 = vld [vmem:[%s1873_s25 + $0x30] sm:$0xff] }
  0x12   : > { %v240_v8 = vld [vmem:[%s1873_s25 + $0x1] sm:$0xff]  ;;  %v208_v11 = vmul.f32 %v1858_v1, %v171_v7  ;;  %v1509_v17 = vld [vmem:[%s1873_s25 + $0x19] sm:$0xff]  ;;  %v480_v21 = vmul.f32 %v1878_v4, %v1476_v14  ;;  %v1927_v27 = vld [vmem:[%s1873_s25 + $0x31] sm:$0xff]  ;;  %v210_v33 = vmul.f32 %v1476_v14, %v1858_v1  ;;  %v784_v35 = vmul.f32 %v1896_v10, %v1917_v19 }
  0x13   : > { %v341_v9 = vld [vmem:[%s1873_s25 + $0x2] sm:$0xff]  ;;  %v277_v12 = vmul.f32 %v1863_v2, %v240_v8  ;;  %v1914_v18 = vld [vmem:[%s1873_s25 + $0x1a] sm:$0xff]  ;;  %v581_v22 = vmul.f32 %v1883_v5, %v1509_v17  ;;  %v1930_v28 = vld [vmem:[%s1873_s25 + $0x32] sm:$0xff]  ;;  %v885_v36 = vmul.f32 %v1905_v15, %v1927_v27  ;;  %v279_v46 = vmul.f32 %v1509_v17, %v1863_v2 }
  0x14   : > { %v378_v13 = vmul.f32 %v1868_v3, %v341_v9  ;;  %v682_v23 = vmul.f32 %v1888_v6, %v1914_v18  ;;  %v187_v24 = vld [vmem:[%s1873_s25 + $0xc0] sm:$0xff]  ;;  %v1936_v32 = vld [vmem:[%s1873_s25 + $0xd8] sm:$0xff]  ;;  %v1945_v37 = vmul.f32 %v1910_v16, %v1930_v28  ;;  %v172_v43 = vld [vmem:[%s1873_s25 + $0x8] sm:$0xff] }
  0x15   : > { %v309_v20 = vadd.f32 %v277_v12, %v208_v11  ;;  %v256_v25 = vld [vmem:[%s1873_s25 + $0xc1] sm:$0xff]  ;;  %v224_v29 = vmul.f32 %v1858_v1, %v187_v24  ;;  %v1948_v38 = vld [vmem:[%s1873_s25 + $0xd9] sm:$0xff]  ;;  %v496_v41 = vmul.f32 %v1878_v4, %v1936_v32  ;;  %v241_v44 = vld [vmem:[%s1873_s25 + $0x9] sm:$0xff]  ;;  %v209_v50 = vmul.f32 %v1858_v1, %v172_v43 }
  0x16   : > { %v357_v26 = vld [vmem:[%s1873_s25 + $0xc2] sm:$0xff]  ;;  %v293_v30 = vmul.f32 %v1863_v2, %v256_v25  ;;  %v1951_v39 = vld [vmem:[%s1873_s25 + $0xda] sm:$0xff]  ;;  %v597_v42 = vmul.f32 %v1883_v5, %v1948_v38  ;;  %v342_v45 = vld [vmem:[%s1873_s25 + $0xa] sm:$0xff]  ;;  %v278_v51 = vmul.f32 %v1863_v2, %v241_v44 }
  0x17   : > { %v394_v31 = vmul.f32 %v1868_v3, %v357_v26  ;;  %v410_v34 = vadd.f32 %v378_v13, %v309_v20  ;;  %v1962_v48 = vld [vmem:[%s1873_s25 + $0xf0] sm:$0xff]  ;;  %v379_v52 = vmul.f32 %v1868_v3, %v342_v45  ;;  %v1971_v53 = vld [vmem:[%s1873_s25 + $0x20] sm:$0xff]  ;;  %v698_v55 = vmul.f32 %v1888_v6, %v1951_v39  ;;  %v188_v0 = vld [vmem:[%s1873_s25 + $0xc8] sm:$0xff] }
  0x18   : > { %v325_v40 = vadd.f32 %v293_v30, %v224_v29  ;;  %v1965_v49 = vld [vmem:[%s1873_s25 + $0xf1] sm:$0xff]  ;;  %v800_v56 = vmul.f32 %v1896_v10, %v1962_v48  ;;  %v1983_v59 = vld [vmem:[%s1873_s25 + $0x21] sm:$0xff]  ;;  %v310_v62 = vadd.f32 %v278_v51, %v209_v50  ;;  %v481_v63 = vmul.f32 %v1878_v4, %v1971_v53  ;;  %v257_v7 = vld [vmem:[%s1873_s25 + $0xc9] sm:$0xff] }
  0x19   : > { %v512_v47 = vadd.f32 %v480_v21, %v410_v34  ;;  %v901_v57 = vmul.f32 %v1905_v15, %v1965_v49  ;;  %v1980_v58 = vld [vmem:[%s1873_s25 + $0xf2] sm:$0xff]  ;;  %v358_v8 = vld [vmem:[%s1873_s25 + $0xca] sm:$0xff]  ;;  %v582_v11 = vmul.f32 %v1883_v5, %v1983_v59  ;;  %v1995_v12 = vld [vmem:[%s1873_s25 + $0x22] sm:$0xff]  ;;  %v225_v13 = vmul.f32 %v1858_v1, %v188_v0 }
  0x1a   : > { %v426_v54 = vadd.f32 %v394_v31, %v325_v40  ;;  %v1002_v61 = vmul.f32 %v1910_v16, %v1980_v58  ;;  %v294_v14 = vmul.f32 %v1863_v2, %v257_v7  ;;  %v2000_v17 = vld [vmem:[%s1873_s25 + $0xe0] sm:$0xff]  ;;  %v411_v21 = vadd.f32 %v379_v52, %v310_v62  ;;  %v2005_v24 = vld [vmem:[%s1873_s25 + $0x38] sm:$0xff] }
  0x1b   : > { %v613_v60 = vadd.f32 %v581_v22, %v512_v47  ;;  %v683_v22 = vmul.f32 %v1888_v6, %v1995_v12  ;;  %v395_v25 = vmul.f32 %v1868_v3, %v358_v8  ;;  %v785_v29 = vmul.f32 %v1896_v10, %v2005_v24  ;;  %v2011_v30 = vld [vmem:[%s1873_s25 + $0x39] sm:$0xff]  ;;  %v2023_v44 = vld [vmem:[%s1873_s25 + $0xe1] sm:$0xff] }
  0x1c   : > { %v528_v9 = vadd.f32 %v496_v41, %v426_v54  ;;  %v2014_v31 = vld [vmem:[%s1873_s25 + $0x3a] sm:$0xff]  ;;  %v326_v34 = vadd.f32 %v294_v14, %v225_v13  ;;  %v513_v41 = vadd.f32 %v481_v63, %v411_v21  ;;  %v886_v43 = vmul.f32 %v1905_v15, %v2011_v30  ;;  %v2053_v21 = vld [vmem:[%s1873_s25 + $0x48] sm:$0xff] }
  0x1d   : > { %v714_v20 = vadd.f32 %v682_v23, %v613_v60  ;;  %v497_v23 = vmul.f32 %v1878_v4, %v2000_v17  ;;  %v598_v50 = vmul.f32 %v1883_v5, %v2023_v44  ;;  %v311_v51 = vadd.f32 %v279_v46, %v210_v33  ;;  %v2028_v60 = vld [vmem:[%s1873_s25 + $0xe2] sm:$0xff]  ;;  %v2043_v8 = vld [vmem:[%s1873_s25 + $0xf9] sm:$0xff] }
  0x1e   : > { %v629_v26 = vadd.f32 %v597_v42, %v528_v9  ;;  %v987_v42 = vmul.f32 %v1910_v16, %v2014_v31  ;;  %v427_v47 = vadd.f32 %v395_v25, %v326_v34  ;;  %v614_v54 = vadd.f32 %v582_v11, %v513_v41 }
  0x1f   : > { %v816_v40 = vadd.f32 %v784_v35, %v714_v20  ;;  %v2031_v35 = vld [vmem:[%s1873_s25 + $0xf8] sm:$0xff]  ;;  %v380_v62 = vmul.f32 %v1914_v18, %v1868_v3  ;;  %v482_v63 = vmul.f32 %v1917_v19, %v1878_v4  ;;  %v699_v7 = vmul.f32 %v1888_v6, %v2028_v60 }
  0x20   : > { %v730_v45 = vadd.f32 %v698_v55, %v629_v26  ;;  %v529_v55 = vadd.f32 %v497_v23, %v427_v47  ;;  %v801_v33 = vmul.f32 %v1896_v10, %v2031_v35  ;;  %v715_v46 = vadd.f32 %v683_v22, %v614_v54 }
  0x21   : > { %v917_v52 = vadd.f32 %v885_v36, %v816_v40  ;;  %v412_v9 = vadd.f32 %v380_v62, %v311_v51  ;;  %v583_v18 = vmul.f32 %v1927_v27, %v1883_v5  ;;  %v902_v13 = vmul.f32 %v1905_v15, %v2043_v8  ;;  %v2079_v62 = vld [vmem:[%s1873_s25 + $0x4a] sm:$0xff] }
  0x22   : > { %v832_v0 = vadd.f32 %v800_v56, %v730_v45  ;;  %v630_v56 = vadd.f32 %v598_v50, %v529_v55  ;;  %v684_v14 = vmul.f32 %v1930_v28, %v1888_v6  ;;  %v226_v22 = vmul.f32 %v1936_v32, %v1858_v1  ;;  %v2067_v45 = vld [vmem:[%s1873_s25 + $0x49] sm:$0xff] }
  0x23   : > { %v1018_v36 = vadd.f32 %v1945_v37, %v917_v52  ;;  %v817_v37 = vadd.f32 %v785_v29, %v715_v46  ;;  %v514_v20 = vadd.f32 %v482_v63, %v412_v9  ;;  %v786_v34 = vmul.f32 %v1896_v10, %v2053_v21  ;;  %v2064_v29 = vld [vmem:[%s1873_s25 + $0xfa] sm:$0xff] }
  0x24   : > { %v933_v11 = vadd.f32 %v901_v57, %v832_v0  ;;  %v295_v57 = vmul.f32 %v1948_v38, %v1863_v2  ;;  %v731_v26 = vadd.f32 %v699_v7, %v630_v56  ;;  %v396_v23 = vmul.f32 %v1951_v39, %v1868_v3 }
  0x25   : > { %1745 = vmatprep.mubr.msk.f32.mxu0 %vm1051_vm1, %v1018_v36  ;;  %v918_v40 = vadd.f32 %v886_v43, %v817_v37  ;;  %v615_v41 = vadd.f32 %v583_v18, %v514_v20  ;;  %v498_v32 = vmul.f32 %v1962_v48, %v1878_v4  ;;  %v887_v39 = vmul.f32 %v1905_v15, %v2067_v45 }
  0x26   : > { %v1034_v25 = vadd.f32 %v1002_v61, %v933_v11  ;;  %v327_v47 = vadd.f32 %v295_v57, %v226_v22  ;;  %v833_v38 = vadd.f32 %v801_v33, %v731_v26  ;;  %v1003_v61 = vmul.f32 %v1910_v16, %v2064_v29 }
  0x27   : > { %v1019_v43 = vadd.f32 %v987_v42, %v918_v40  ;;  %v716_v50 = vadd.f32 %v684_v14, %v615_v41  ;;  %v599_v52 = vmul.f32 %v1965_v49, %v1883_v5  ;;  %v211_v63 = vmul.f32 %v1971_v53, %v1858_v1  ;;  %v2093_v53 = vld [vmem:[%s1873_s25 + $0x108] sm:$0xff]  ;;  %v2121_v41 = vld [vmem:[%s1873_s25 + $0x50] sm:$0xff] }
  0x28   : > { %1769 = vmatprep.mubr.msk.f32.mxu1 %vm1051_vm1, %v1034_v25  ;;  %v428_v51 = vadd.f32 %v396_v23, %v327_v47  ;;  %v934_v54 = vadd.f32 %v902_v13, %v833_v38  ;;  %v280_v0 = vmul.f32 %v1983_v59, %v1863_v2  ;;  %v381_v55 = vmul.f32 %v1995_v12, %v1868_v3  ;;  %v2103_v13 = vld [vmem:[%s1873_s25 + $0x109] sm:$0xff] }
  0x29   : > { %1746 = vmatmul.mubr.msk.f32.vlgmr.msra.gmra.mrb[0].mxu0 %vm1051_vm1, %v1019_v43  ;;  %v818_v42 = vadd.f32 %v786_v34, %v716_v50  ;;  %v988_v7 = vmul.f32 %v1910_v16, %v2079_v62  ;;  %v700_v36 = vmul.f32 %v1980_v58, %v1888_v6  ;;  %v483_v59 = vmul.f32 %v2005_v24, %v1878_v4  ;;  %v2106_v14 = vld [vmem:[%s1873_s25 + $0x10a] sm:$0xff]  ;;  %v2136_v50 = vld [vmem:[%s1873_s25 + $0x52] sm:$0xff] }
  0x2a   : > { %v530_v33 = vadd.f32 %v498_v32, %v428_v51  ;;  %v1035_v46 = vadd.f32 %v1003_v61, %v934_v54  ;;  %v312_v9 = vadd.f32 %v280_v0, %v211_v63  ;;  %v802_v11 = vmul.f32 %v1896_v10, %v2093_v53  ;;  %v2133_v43 = vld [vmem:[%s1873_s25 + $0x51] sm:$0xff] }
  0x2b   : > { %v919_v18 = vadd.f32 %v887_v39, %v818_v42  ;;  %v584_v56 = vmul.f32 %v2011_v30, %v1883_v5  ;;  %v227_v20 = vmul.f32 %v2000_v17, %v1858_v1  ;;  %v296_v22 = vmul.f32 %v2023_v44, %v1863_v2 }
  0x2c   : > { %v631_v12 = vadd.f32 %v599_v52, %v530_v33  ;;  %1770 = vmatmul.mubr.msk.f32.vlgmr.msra.gmra.mrb[0].mxu1 %vm1051_vm1, %v1035_v46  ;;  %v413_v37 = vadd.f32 %v381_v55, %v312_v9  ;;  %v397_v57 = vmul.f32 %v2028_v60, %v1868_v3  ;;  %v903_v34 = vmul.f32 %v1905_v15, %v2103_v13  ;;  %v2149_v33 = vld [vmem:[%s1873_s25 + $0x110] sm:$0xff] }
  0x2d   : > { %v1020_v25 = vadd.f32 %v988_v7, %v919_v18  ;;  %v1004_v23 = vmul.f32 %v1910_v16, %v2106_v14  ;;  %v685_v17 = vmul.f32 %v2014_v31, %v1888_v6  ;;  %v328_v44 = vadd.f32 %v296_v22, %v227_v20 }
  0x2e   : > { %v732_v26 = vadd.f32 %v700_v36, %v631_v12  ;;  %v515_v40 = vadd.f32 %v483_v59, %v413_v37  ;;  %v499_v60 = vmul.f32 %v2031_v35, %v1878_v4  ;;  %v787_v32 = vmul.f32 %v1896_v10, %v2121_v41 }
  0x2f   : > { %1748 = vmatprep.mubr.msk.f32.mxu0 %vm1051_vm1, %v1020_v25  ;;  %v600_v38 = vmul.f32 %v2043_v8, %v1883_v5  ;;  %v212_v61 = vmul.f32 %v1917_v19, %v1858_v1  ;;  %v429_v51 = vadd.f32 %v397_v57, %v328_v44  ;;  %v281_v52 = vmul.f32 %v1927_v27, %v1863_v2 }
  0x30   : > { %v834_v47 = vadd.f32 %v802_v11, %v732_v26  ;;  %v616_v39 = vadd.f32 %v584_v56, %v515_v40  ;;  %v382_v54 = vmul.f32 %v1930_v28, %v1868_v3  ;;  %v888_v0 = vmul.f32 %v1905_v15, %v2133_v43  ;;  %v2160_v11 = vld [vmem:[%s1873_s25 + $0x111] sm:$0xff] }
  0x31   : > { %v989_v19 = vmul.f32 %v1910_v16, %v2136_v50  ;;  %v701_v55 = vmul.f32 %v2064_v29, %v1888_v6  ;;  %v531_v7 = vadd.f32 %v499_v60, %v429_v51  ;;  %v313_v36 = vadd.f32 %v281_v52, %v212_v61  ;;  %v2188_v61 = vld [vmem:[%s1873_s25 + $0x61] sm:$0xff] }
  0x32   : > { %v935_v63 = vadd.f32 %v903_v34, %v834_v47  ;;  %v717_v42 = vadd.f32 %v685_v17, %v616_v39  ;;  %v484_v27 = vmul.f32 %v2053_v21, %v1878_v4  ;;  %v803_v46 = vmul.f32 %v1896_v10, %v2149_v33  ;;  %v2174_v34 = vld [vmem:[%s1873_s25 + $0x112] sm:$0xff]  ;;  %v2191_v39 = vld [vmem:[%s1873_s25 + $0x62] sm:$0xff] }
  0x33   : > { %v585_v9 = vmul.f32 %v2067_v45, %v1883_v5  ;;  %v228_v59 = vmul.f32 %v1962_v48, %v1858_v1  ;;  %v632_v12 = vadd.f32 %v600_v38, %v531_v7  ;;  %v414_v56 = vadd.f32 %v382_v54, %v313_v36  ;;  %v2205_v7 = vld [vmem:[%s1873_s25 + $0x120] sm:$0xff] }
  0x34   : > { %v1036_v28 = vadd.f32 %v1004_v23, %v935_v63  ;;  %v819_v18 = vadd.f32 %v787_v32, %v717_v42  ;;  %v297_v37 = vmul.f32 %v1965_v49, %v1863_v2  ;;  %v904_v20 = vmul.f32 %v1905_v15, %v2160_v11  ;;  %v2177_v23 = vld [vmem:[%s1873_s25 + $0x60] sm:$0xff] }
  0x35   : > { %v686_v22 = vmul.f32 %v2079_v62, %v1888_v6  ;;  %v398_v48 = vmul.f32 %v1980_v58, %v1868_v3  ;;  %v500_v57 = vmul.f32 %v2093_v53, %v1878_v4  ;;  %v733_v26 = vadd.f32 %v701_v55, %v632_v12  ;;  %v2208_v36 = vld [vmem:[%s1873_s25 + $0x121] sm:$0xff] }
  0x36   : > { %1772 = vmatprep.mubr.msk.f32.mxu1 %vm1051_vm1, %v1036_v28  ;;  %v920_v25 = vadd.f32 %v888_v0, %v819_v18  ;;  %v516_v49 = vadd.f32 %v484_v27, %v414_v56  ;;  %v329_v40 = vadd.f32 %v297_v37, %v228_v59  ;;  %v1005_v17 = vmul.f32 %v1910_v16, %v2174_v34  ;;  %v2219_v12 = vld [vmem:[%s1873_s25 + $0x122] sm:$0xff] }
  0x37   : > { %v788_v44 = vmul.f32 %v1896_v10, %v2177_v23  ;;  %v601_v58 = vmul.f32 %v2103_v13, %v1883_v5  ;;  %v213_v60 = vmul.f32 %v2005_v24, %v1858_v1  ;;  %v835_v32 = vadd.f32 %v803_v46, %v733_v26  ;;  %v2233_v26 = vld [vmem:[%s1873_s25 + $0x68] sm:$0xff] }
  0x38   : > { %v1021_v47 = vadd.f32 %v989_v19, %v920_v25  ;;  %v617_v38 = vadd.f32 %v585_v9, %v516_v49  ;;  %v430_v51 = vadd.f32 %v398_v48, %v329_v40  ;;  %v889_v52 = vmul.f32 %v1905_v15, %v2188_v61 }
  0x39   : > { %v990_v54 = vmul.f32 %v1910_v16, %v2191_v39  ;;  %v282_v63 = vmul.f32 %v2011_v30, %v1863_v2  ;;  %v383_v24 = vmul.f32 %v2014_v31, %v1868_v3  ;;  %v936_v0 = vadd.f32 %v904_v20, %v835_v32  ;;  %v2244_v32 = vld [vmem:[%s1873_s25 + $0x69] sm:$0xff] }
  0x3a   : > { %1749 = vmatmul.mubr.msk.f32.gmra.mrb[2].mxu0 %vm1051_vm1, %v1021_v47  ;;  %v718_v19 = vadd.f32 %v686_v22, %v617_v38  ;;  %v532_v55 = vadd.f32 %v500_v57, %v430_v51  ;;  %v702_v42 = vmul.f32 %v2106_v14, %v1888_v6  ;;  %v804_v27 = vmul.f32 %v1896_v10, %v2205_v7  ;;  %v2247_v38 = vld [vmem:[%s1873_s25 + $0x6a] sm:$0xff] }
  0x3b   : > { %v905_v30 = vmul.f32 %v1905_v15, %v2208_v36  ;;  %v314_v31 = vadd.f32 %v282_v63, %v213_v60  ;;  %v485_v28 = vmul.f32 %v2121_v41, %v1878_v4  ;;  %v1037_v46 = vadd.f32 %v1005_v17, %v936_v0 }
  0x3c   : > { %v820_v9 = vadd.f32 %v788_v44, %v718_v19  ;;  %v633_v59 = vadd.f32 %v601_v58, %v532_v55  ;;  %v229_v18 = vmul.f32 %v2031_v35, %v1858_v1  ;;  %v586_v37 = vmul.f32 %v2133_v43, %v1883_v5 }
  0x3d   : > { %v415_v56 = vadd.f32 %v383_v24, %v314_v31  ;;  %v298_v20 = vmul.f32 %v2043_v8, %v1863_v2  ;;  %v399_v22 = vmul.f32 %v2064_v29, %v1868_v3  ;;  %1773 = vmatmul.mubr.msk.f32.gmra.mrb[2].mxu1 %vm1051_vm1, %v1037_v46  ;;  %v1006_v35 = vmul.f32 %v1910_v16, %v2219_v12 }
  0x3e   : > { %v921_v48 = vadd.f32 %v889_v52, %v820_v9  ;;  %v734_v57 = vadd.f32 %v702_v42, %v633_v59  ;;  %v687_v25 = vmul.f32 %v2136_v50, %v1888_v6  ;;  %v789_v8 = vmul.f32 %v1896_v10, %v2233_v26  ;;  %v2261_v42 = vld [vmem:[%s1873_s25 + $0x128] sm:$0xff] }
  0x3f   : > { %v517_v49 = vadd.f32 %v485_v28, %v415_v56  ;;  %v330_v40 = vadd.f32 %v298_v20, %v229_v18  ;;  %v501_v29 = vmul.f32 %v2149_v33, %v1878_v4  ;;  %v602_v58 = vmul.f32 %v2160_v11, %v1883_v5  ;;  %v2272_v59 = vld [vmem:[%s1873_s25 + $0x129] sm:$0xff] }
  0x40   : > { %v1022_v17 = vadd.f32 %v990_v54, %v921_v48  ;;  %v836_v44 = vadd.f32 %v804_v27, %v734_v57  ;;  %v214_v60 = vmul.f32 %v2053_v21, %v1858_v1  ;;  %v283_v52 = vmul.f32 %v2067_v45, %v1863_v2 }
  0x41   : > { %v618_v47 = vadd.f32 %v586_v37, %v517_v49  ;;  %v431_v51 = vadd.f32 %v399_v22, %v330_v40  ;;  %v384_v54 = vmul.f32 %v2079_v62, %v1868_v3  ;;  %v890_v24 = vmul.f32 %v1905_v15, %v2244_v32 }
  0x42   : > { %1751 = vmatprep.mubr.msk.f32.mxu0 %vm1051_vm1, %v1022_v17  ;;  %v937_v63 = vadd.f32 %v905_v30, %v836_v44  ;;  %v991_v21 = vmul.f32 %v1910_v16, %v2247_v38  ;;  %v703_v0 = vmul.f32 %v2174_v34, %v1888_v6  ;;  %v315_v45 = vadd.f32 %v283_v52, %v214_v60  ;;  %v2300_v60 = vld [vmem:[%s1873_s25 + $0x79] sm:$0xff] }
  0x43   : > { %v719_v19 = vadd.f32 %v687_v25, %v618_v47  ;;  %v533_v55 = vadd.f32 %v501_v29, %v431_v51  ;;  %v486_v62 = vmul.f32 %v2177_v23, %v1878_v4  ;;  %v805_v30 = vmul.f32 %v1896_v10, %v2261_v42  ;;  %v2289_v25 = vld [vmem:[%s1873_s25 + $0x78] sm:$0xff] }
  0x44   : > { %v1038_v27 = vadd.f32 %v1006_v35, %v937_v63  ;;  %v587_v31 = vmul.f32 %v2188_v61, %v1883_v5  ;;  %v230_v28 = vmul.f32 %v2093_v53, %v1858_v1  ;;  %v416_v18 = vadd.f32 %v384_v54, %v315_v45  ;;  %v2286_v35 = vld [vmem:[%s1873_s25 + $0x12a] sm:$0xff]  ;;  %v2303_v47 = vld [vmem:[%s1873_s25 + $0x7a] sm:$0xff] }
  0x45   : > { %v821_v46 = vadd.f32 %v789_v8, %v719_v19  ;;  %v634_v9 = vadd.f32 %v602_v58, %v533_v55  ;;  %v299_v56 = vmul.f32 %v2103_v13, %v1863_v2  ;;  %v906_v37 = vmul.f32 %v1905_v15, %v2272_v59  ;;  %v2317_v55 = vld [vmem:[%s1873_s25 + $0x138] sm:$0xff] }
  0x46   : > { %1775 = vmatprep.mubr.msk.f32.mxu1 %vm1051_vm1, %v1038_v27  ;;  %v688_v20 = vmul.f32 %v2191_v39, %v1888_v6  ;;  %v400_v53 = vmul.f32 %v2106_v14, %v1868_v3  ;;  %v502_v22 = vmul.f32 %v2205_v7, %v1878_v4  ;;  %v518_v13 = vadd.f32 %v486_v62, %v416_v18  ;;  %v2320_v45 = vld [vmem:[%s1873_s25 + $0x139] sm:$0xff] }
  0x47   : > { %v922_v48 = vadd.f32 %v890_v24, %v821_v46  ;;  %v735_v57 = vadd.f32 %v703_v0, %v634_v9  ;;  %v331_v49 = vadd.f32 %v299_v56, %v230_v28  ;;  %v1007_v8 = vmul.f32 %v1910_v16, %v2286_v35  ;;  %v2331_v9 = vld [vmem:[%s1873_s25 + $0x13a] sm:$0xff] }
  0x48   : > { %v790_v40 = vmul.f32 %v1896_v10, %v2289_v25  ;;  %v603_v14 = vmul.f32 %v2208_v36, %v1883_v5  ;;  %v215_v29 = vmul.f32 %v2121_v41, %v1858_v1  ;;  %v619_v58 = vadd.f32 %v587_v31, %v518_v13 }
  0x49   : > { %v1023_v17 = vadd.f32 %v991_v21, %v922_v48  ;;  %v837_v44 = vadd.f32 %v805_v30, %v735_v57  ;;  %v432_v51 = vadd.f32 %v400_v53, %v331_v49  ;;  %v891_v52 = vmul.f32 %v1905_v15, %v2300_v60  ;;  %v2345_v57 = vld [vmem:[%s1873_s25 + $0x80] sm:$0xff] }
  0x4a   : > { %v992_v54 = vmul.f32 %v1910_v16, %v2303_v47  ;;  %v284_v63 = vmul.f32 %v2133_v43, %v1863_v2  ;;  %v385_v41 = vmul.f32 %v2136_v50, %v1868_v3  ;;  %v720_v21 = vadd.f32 %v688_v20, %v619_v58  ;;  %v2359_v58 = vld [vmem:[%s1873_s25 + $0x82] sm:$0xff] }
  0x4b   : > { %1752 = vmatmul.mubr.msk.f32.gmra.mrb[4].mxu0 %vm1051_vm1, %v1023_v17  ;;  %v938_v24 = vadd.f32 %v906_v37, %v837_v44  ;;  %v534_v0 = vadd.f32 %v502_v22, %v432_v51  ;;  %v704_v19 = vmul.f32 %v2219_v12, %v1888_v6  ;;  %v806_v62 = vmul.f32 %v1896_v10, %v2317_v55  ;;  %v2356_v44 = vld [vmem:[%s1873_s25 + $0x81] sm:$0xff] }
  0x4c   : > { %v907_v43 = vmul.f32 %v1905_v15, %v2320_v45  ;;  %v316_v50 = vadd.f32 %v284_v63, %v215_v29  ;;  %v487_v27 = vmul.f32 %v2233_v26, %v1878_v4  ;;  %v822_v31 = vadd.f32 %v790_v40, %v720_v21 }
  0x4d   : > { %v1039_v30 = vadd.f32 %v1007_v8, %v938_v24  ;;  %v635_v28 = vadd.f32 %v603_v14, %v534_v0  ;;  %v231_v46 = vmul.f32 %v2149_v33, %v1858_v1  ;;  %v588_v56 = vmul.f32 %v2244_v32, %v1883_v5 }
  0x4e   : > { %v417_v18 = vadd.f32 %v385_v41, %v316_v50  ;;  %v300_v37 = vmul.f32 %v2160_v11, %v1863_v2  ;;  %v401_v20 = vmul.f32 %v2174_v34, %v1868_v3  ;;  %v923_v53 = vadd.f32 %v891_v52, %v822_v31 }
  0x4f   : > { %1776 = vmatmul.mubr.msk.f32.gmra.mrb[4].mxu1 %vm1051_vm1, %v1039_v30  ;;  %v736_v22 = vadd.f32 %v704_v19, %v635_v28  ;;  %v1008_v33 = vmul.f32 %v1910_v16, %v2331_v9  ;;  %v689_v48 = vmul.f32 %v2247_v38, %v1888_v6  ;;  %v791_v11 = vmul.f32 %v1896_v10, %v2345_v57  ;;  %v2373_v19 = vld [vmem:[%s1873_s25 + $0x140] sm:$0xff] }
  0x50   : > { %v519_v13 = vadd.f32 %v487_v27, %v417_v18  ;;  %v332_v49 = vadd.f32 %v300_v37, %v231_v46  ;;  %v503_v34 = vmul.f32 %v2261_v42, %v1878_v4  ;;  %v1024_v8 = vadd.f32 %v992_v54, %v923_v53  ;;  %v2384_v28 = vld [vmem:[%s1873_s25 + $0x141] sm:$0xff] }
  0x51   : > { %v838_v40 = vadd.f32 %v806_v62, %v736_v22  ;;  %v604_v14 = vmul.f32 %v2272_v59, %v1883_v5  ;;  %v216_v29 = vmul.f32 %v2177_v23, %v1858_v1  ;;  %v285_v52 = vmul.f32 %v2188_v61, %v1863_v2 }
  0x52   : > { %v620_v17 = vadd.f32 %v588_v56, %v519_v13  ;;  %v433_v51 = vadd.f32 %v401_v20, %v332_v49  ;;  %v386_v54 = vmul.f32 %v2191_v39, %v1868_v3  ;;  %1754 = vmatprep.mubr.msk.f32.mxu0 %vm1051_vm1, %v1024_v8  ;;  %v892_v41 = vmul.f32 %v1905_v15, %v2356_v44 }
  0x53   : > { %v939_v63 = vadd.f32 %v907_v43, %v838_v40  ;;  %v993_v23 = vmul.f32 %v1910_v16, %v2359_v58  ;;  %v705_v24 = vmul.f32 %v2286_v35, %v1888_v6  ;;  %v317_v61 = vadd.f32 %v285_v52, %v216_v29  ;;  %v2412_v29 = vld [vmem:[%s1873_s25 + $0x91] sm:$0xff] }
  0x54   : > { %v721_v21 = vadd.f32 %v689_v48, %v620_v17  ;;  %v535_v0 = vadd.f32 %v503_v34, %v433_v51  ;;  %v488_v39 = vmul.f32 %v2289_v25, %v1878_v4  ;;  %v807_v43 = vmul.f32 %v1896_v10, %v2373_v19  ;;  %v2401_v48 = vld [vmem:[%s1873_s25 + $0x90] sm:$0xff] }
  0x55   : > { %v1040_v62 = vadd.f32 %v1008_v33, %v939_v63  ;;  %v589_v50 = vmul.f32 %v2300_v60, %v1883_v5  ;;  %v232_v27 = vmul.f32 %v2205_v7, %v1858_v1  ;;  %v418_v46 = vadd.f32 %v386_v54, %v317_v61  ;;  %v2398_v33 = vld [vmem:[%s1873_s25 + $0x142] sm:$0xff]  ;;  %v2415_v17 = vld [vmem:[%s1873_s25 + $0x92] sm:$0xff] }
  0x56   : > { %v823_v30 = vadd.f32 %v791_v11, %v721_v21  ;;  %v636_v31 = vadd.f32 %v604_v14, %v535_v0  ;;  %v301_v18 = vmul.f32 %v2208_v36, %v1863_v2  ;;  %v908_v56 = vmul.f32 %v1905_v15, %v2384_v28  ;;  %v2429_v0 = vld [vmem:[%s1873_s25 + $0x150] sm:$0xff] }
  0x57   : > { %1778 = vmatprep.mubr.msk.f32.mxu1 %vm1051_vm1, %v1040_v62  ;;  %v690_v37 = vmul.f32 %v2303_v47, %v1888_v6  ;;  %v402_v7 = vmul.f32 %v2219_v12, %v1868_v3  ;;  %v504_v20 = vmul.f32 %v2317_v55, %v1878_v4  ;;  %v520_v36 = vadd.f32 %v488_v39, %v418_v46  ;;  %v2432_v61 = vld [vmem:[%s1873_s25 + $0x151] sm:$0xff] }
  0x58   : > { %v924_v53 = vadd.f32 %v892_v41, %v823_v30  ;;  %v737_v22 = vadd.f32 %v705_v24, %v636_v31  ;;  %v333_v13 = vadd.f32 %v301_v18, %v232_v27  ;;  %v1009_v11 = vmul.f32 %v1910_v16, %v2398_v33  ;;  %v2443_v31 = vld [vmem:[%s1873_s25 + $0x152] sm:$0xff] }
  0x59   : > { %v792_v49 = vmul.f32 %v1896_v10, %v2401_v48  ;;  %v605_v12 = vmul.f32 %v2320_v45, %v1883_v5  ;;  %v217_v34 = vmul.f32 %v2233_v26, %v1858_v1  ;;  %v621_v14 = vadd.f32 %v589_v50, %v520_v36 }
  0x5a   : > { %v1025_v8 = vadd.f32 %v993_v23, %v924_v53  ;;  %v839_v40 = vadd.f32 %v807_v43, %v737_v22  ;;  %v434_v51 = vadd.f32 %v402_v7, %v333_v13  ;;  %v893_v52 = vmul.f32 %v1905_v15, %v2412_v29  ;;  %v2457_v22 = vld [vmem:[%s1873_s25 + $0x98] sm:$0xff] }
  0x5b   : > { %v994_v54 = vmul.f32 %v1910_v16, %v2415_v17  ;;  %v286_v63 = vmul.f32 %v2244_v32, %v1863_v2  ;;  %v387_v26 = vmul.f32 %v2247_v38, %v1868_v3  ;;  %v722_v23 = vadd.f32 %v690_v37, %v621_v14  ;;  %v2471_v14 = vld [vmem:[%s1873_s25 + $0x9a] sm:$0xff] }
  0x5c   : > { %1755 = vmatmul.mubr.msk.f32.gmra.mrb[6].mxu0 %vm1051_vm1, %v1025_v8  ;;  %v940_v41 = vadd.f32 %v908_v56, %v839_v40  ;;  %v536_v24 = vadd.f32 %v504_v20, %v434_v51  ;;  %v706_v21 = vmul.f32 %v2331_v9, %v1888_v6  ;;  %v808_v39 = vmul.f32 %v1896_v10, %v2429_v0  ;;  %v2468_v40 = vld [vmem:[%s1873_s25 + $0x99] sm:$0xff] }
  0x5d   : > { %v909_v32 = vmul.f32 %v1905_v15, %v2432_v61  ;;  %v318_v38 = vadd.f32 %v286_v63, %v217_v34  ;;  %v489_v62 = vmul.f32 %v2345_v57, %v1878_v4  ;;  %v824_v50 = vadd.f32 %v792_v49, %v722_v23 }
  0x5e   : > { %v1041_v43 = vadd.f32 %v1009_v11, %v940_v41  ;;  %v637_v27 = vadd.f32 %v605_v12, %v536_v24  ;;  %v233_v30 = vmul.f32 %v2261_v42, %v1858_v1  ;;  %v590_v18 = vmul.f32 %v2356_v44, %v1883_v5 }
  0x5f   : > { %v419_v46 = vadd.f32 %v387_v26, %v318_v38  ;;  %v302_v56 = vmul.f32 %v2272_v59, %v1863_v2  ;;  %v403_v37 = vmul.f32 %v2286_v35, %v1868_v3  ;;  %v925_v7 = vadd.f32 %v893_v52, %v824_v50 }
  0x60   : > { %1779 = vmatmul.mubr.msk.f32.gmra.mrb[6].mxu1 %vm1051_vm1, %v1041_v43  ;;  %v738_v20 = vadd.f32 %v706_v21, %v637_v27  ;;  %v1010_v42 = vmul.f32 %v1910_v16, %v2443_v31  ;;  %v691_v53 = vmul.f32 %v2359_v58, %v1888_v6  ;;  %v793_v59 = vmul.f32 %v1896_v10, %v2457_v22  ;;  %v2485_v21 = vld [vmem:[%s1873_s25 + $0x158] sm:$0xff] }
  0x61   : > { %v521_v36 = vadd.f32 %v489_v62, %v419_v46  ;;  %v334_v13 = vadd.f32 %v302_v56, %v233_v30  ;;  %v505_v35 = vmul.f32 %v2373_v19, %v1878_v4  ;;  %v1026_v11 = vadd.f32 %v994_v54, %v925_v7  ;;  %v2496_v27 = vld [vmem:[%s1873_s25 + $0x159] sm:$0xff] }
  0x62   : > { %v840_v49 = vadd.f32 %v808_v39, %v738_v20  ;;  %v606_v12 = vmul.f32 %v2384_v28, %v1883_v5  ;;  %v218_v34 = vmul.f32 %v2289_v25, %v1858_v1  ;;  %v287_v52 = vmul.f32 %v2300_v60, %v1863_v2 }
  0x63   : > { %v622_v8 = vadd.f32 %v590_v18, %v521_v36  ;;  %v435_v51 = vadd.f32 %v403_v37, %v334_v13  ;;  %v388_v54 = vmul.f32 %v2303_v47, %v1868_v3  ;;  %1757 = vmatprep.mubr.msk.f32.mxu0 %vm1051_vm1, %v1026_v11  ;;  %v894_v26 = vmul.f32 %v1905_v15, %v2468_v40 }
  0x64   : > { %v941_v63 = vadd.f32 %v909_v32, %v840_v49  ;;  %v995_v25 = vmul.f32 %v1910_v16, %v2471_v14  ;;  %v707_v41 = vmul.f32 %v2398_v33, %v1888_v6  ;;  %v319_v60 = vadd.f32 %v287_v52, %v218_v34  ;;  %v2524_v34 = vld [vmem:[%s1873_s25 + $0xa9] sm:$0xff] }
  0x65   : > { %v723_v23 = vadd.f32 %v691_v53, %v622_v8  ;;  %v537_v24 = vadd.f32 %v505_v35, %v435_v51  ;;  %v490_v47 = vmul.f32 %v2401_v48, %v1878_v4  ;;  %v809_v32 = vmul.f32 %v1896_v10, %v2485_v21  ;;  %v2513_v53 = vld [vmem:[%s1873_s25 + $0xa8] sm:$0xff] }
  0x66   : > { %v1042_v39 = vadd.f32 %v1010_v42, %v941_v63  ;;  %v591_v38 = vmul.f32 %v2412_v29, %v1883_v5  ;;  %v234_v62 = vmul.f32 %v2317_v55, %v1858_v1  ;;  %v420_v30 = vadd.f32 %v388_v54, %v319_v60  ;;  %v2510_v42 = vld [vmem:[%s1873_s25 + $0x15a] sm:$0xff]  ;;  %v2527_v8 = vld [vmem:[%s1873_s25 + $0xaa] sm:$0xff] }
  0x67   : > { %v825_v43 = vadd.f32 %v793_v59, %v723_v23  ;;  %v638_v50 = vadd.f32 %v606_v12, %v537_v24  ;;  %v303_v46 = vmul.f32 %v2320_v45, %v1863_v2  ;;  %v910_v18 = vmul.f32 %v1905_v15, %v2496_v27  ;;  %v2541_v24 = vld [vmem:[%s1873_s25 + $0x168] sm:$0xff] }
  0x68   : > { %1781 = vmatprep.mubr.msk.f32.mxu1 %vm1051_vm1, %v1042_v39  ;;  %v692_v56 = vmul.f32 %v2415_v17, %v1888_v6  ;;  %v404_v55 = vmul.f32 %v2331_v9, %v1868_v3  ;;  %v506_v37 = vmul.f32 %v2429_v0, %v1878_v4  ;;  %v522_v45 = vadd.f32 %v490_v47, %v420_v30  ;;  %v2544_v60 = vld [vmem:[%s1873_s25 + $0x169] sm:$0xff] }
  0x69   : > { %v926_v7 = vadd.f32 %v894_v26, %v825_v43  ;;  %v739_v20 = vadd.f32 %v707_v41, %v638_v50  ;;  %v335_v36 = vadd.f32 %v303_v46, %v234_v62  ;;  %v1011_v59 = vmul.f32 %v1910_v16, %v2510_v42  ;;  %v2555_v50 = vld [vmem:[%s1873_s25 + $0x16a] sm:$0xff] }
  0x6a   : > { %v794_v13 = vmul.f32 %v1896_v10, %v2513_v53  ;;  %v607_v9 = vmul.f32 %v2432_v61, %v1883_v5  ;;  %v219_v35 = vmul.f32 %v2345_v57, %v1858_v1  ;;  %v623_v12 = vadd.f32 %v591_v38, %v522_v45 }
  0x6b   : > { %v1027_v11 = vadd.f32 %v995_v25, %v926_v7  ;;  %v841_v49 = vadd.f32 %v809_v32, %v739_v20  ;;  %v436_v51 = vadd.f32 %v404_v55, %v335_v36  ;;  %v895_v52 = vmul.f32 %v1905_v15, %v2524_v34  ;;  %v2569_v20 = vld [vmem:[%s1873_s25 + $0xb0] sm:$0xff] }
  0x6c   : > { %v996_v54 = vmul.f32 %v1910_v16, %v2527_v8  ;;  %v288_v63 = vmul.f32 %v2356_v44, %v1863_v2  ;;  %v389_v57 = vmul.f32 %v2359_v58, %v1868_v3  ;;  %v724_v25 = vadd.f32 %v692_v56, %v623_v12 }
  0x6d   : > { %1758 = vmatmul.mubr.msk.f32.gmra.mrb[8].mxu0 %vm1051_vm1, %v1027_v11  ;;  %v942_v26 = vadd.f32 %v910_v18, %v841_v49  ;;  %v538_v41 = vadd.f32 %v506_v37, %v436_v51  ;;  %v708_v23 = vmul.f32 %v2443_v31, %v1888_v6  ;;  %v810_v47 = vmul.f32 %v1896_v10, %v2541_v24 }
  0x6e   : > { %v911_v44 = vmul.f32 %v1905_v15, %v2544_v60  ;;  %v320_v58 = vadd.f32 %v288_v63, %v219_v35  ;;  %v491_v39 = vmul.f32 %v2457_v22, %v1878_v4  ;;  %v826_v38 = vadd.f32 %v794_v13, %v724_v25  ;;  %v2583_v35 = vld [vmem:[%s1873_s25 + $0xb2] sm:$0xff] }
  0x6f   : > { %v1043_v32 = vadd.f32 %v1011_v59, %v942_v26  ;;  %v639_v62 = vadd.f32 %v607_v9, %v538_v41  ;;  %v235_v43 = vmul.f32 %v2373_v19, %v1858_v1  ;;  %v592_v46 = vmul.f32 %v2468_v40, %v1883_v5  ;;  %v2624_v26 = vld [vmem:[%s2903_s1 + $0x6] ss:$0 sm:$0xff]  ;;  %v2631_v41 = vld [vmem:[%s2903_s1 + $0x4] ss:$0 sm:$0xff] }
  0x70   : > { %v421_v30 = vadd.f32 %v389_v57, %v320_v58  ;;  %v304_v18 = vmul.f32 %v2384_v28, %v1863_v2  ;;  %v405_v56 = vmul.f32 %v2398_v33, %v1868_v3  ;;  %v927_v55 = vadd.f32 %v895_v52, %v826_v38 }
  0x71   : > { %1782 = vmatmul.mubr.msk.f32.gmra.mrb[8].mxu1 %vm1051_vm1, %v1043_v32  ;;  %v740_v37 = vadd.f32 %v708_v23, %v639_v62  ;;  %v1012_v19 = vmul.f32 %v1910_v16, %v2555_v50  ;;  %v693_v7 = vmul.f32 %v2471_v14, %v1888_v6  ;;  %v795_v2 = vmul.f32 %v1896_v10, %v2569_v20  ;;  %v2580_v6 = vld [vmem:[%s1873_s25 + $0xb1] sm:$0xff]  ;;  %v2588_v10 = vld [vmem:[%s2903_s1 + $0x1] ss:$0 sm:$0xff] }
  0x72   : > { %v523_v45 = vadd.f32 %v491_v39, %v421_v30  ;;  %v336_v28 = vadd.f32 %v304_v18, %v235_v43  ;;  %v507_v3 = vmul.f32 %v2485_v21, %v1878_v4  ;;  %v1028_v33 = vadd.f32 %v996_v54, %v927_v55  ;;  %v2612_v54 = vld [vmem:[%s1873_s25 + $0x170] sm:$0xff]  ;;  %v2651_v43 = vld [vmem:[%s2903_s1 + $0x7] ss:$0 sm:$0xff] }
  0x73   : > { %v842_v36 = vadd.f32 %v810_v47, %v740_v37  ;;  %v608_v59 = vmul.f32 %v2496_v27, %v1883_v5  ;;  %v220_v13 = vmul.f32 %v2401_v48, %v1858_v1  ;;  %v289_v4 = vmul.f32 %v2588_v10, %v2412_v29  ;;  %v2595_v5 = vld [vmem:[%s2903_s1 + $0x2] ss:$0 sm:$0xff]  ;;  %v2607_v29 = vld [vmem:[%s2903_s1 + $0x5] ss:$0 sm:$0xff]  ;;  %v2638_v47 = vld [vmem:[%s2903_s1] ss:$0 sm:$0xff] }
  0x74   : > { %v624_v9 = vadd.f32 %v592_v46, %v523_v45  ;;  %v437_v11 = vadd.f32 %v405_v56, %v336_v28  ;;  %v390_v1 = vmul.f32 %v2595_v5, %v2415_v17  ;;  %1760 = vmatprep.mubr.msk.f32.mxu0 %vm1051_vm1, %v1028_v33  ;;  %v896_v49 = vmul.f32 %v1905_v15, %v2580_v6  ;;  %v2617_v15 = vld [vmem:[%s2903_s1 + $0x3] ss:$0 sm:$0xff]  ;;  %v2643_v32 = vld [vmem:[%s1873_s25 + $0x171] sm:$0xff]  ;;  %v2670_v45 = vld [vmem:[%s2903_s1 + $0x8] ss:$0 sm:$0xff] }
  0x75   : > { %v943_v48 = vadd.f32 %v911_v44, %v842_v36  ;;  %v997_v12 = vmul.f32 %v1910_v16, %v2583_v35  ;;  %v709_v51 = vmul.f32 %v2607_v29, %v2510_v42  ;;  %v321_v63 = vadd.f32 %v289_v4, %v220_v13  ;;  %v2662_v55 = vld [vmem:[%s1873_s25 + $0x172] sm:$0xff]  ;;  %v1620_v13 = vld [vmem:[%s1873_s25 + $0xc1] sm:$0xff] }
  0x76   : > { %v725_v52 = vadd.f32 %v693_v7, %v624_v9  ;;  %v539_v17 = vadd.f32 %v507_v3, %v437_v11  ;;  %v492_v16 = vmul.f32 %v2617_v15, %v2513_v53  ;;  %v811_v25 = vmul.f32 %v2624_v26, %v2612_v54  ;;  %v2682_v9 = vld [vmem:[%s1873_s25 + $0xc2] sm:$0xff] }
  0x77   : > { %v1044_v57 = vadd.f32 %v1012_v19, %v943_v48  ;;  %v593_v23 = vmul.f32 %v2631_v41, %v2524_v34  ;;  %v236_v44 = vmul.f32 %v2638_v47, %v2429_v0  ;;  %v422_v38 = vadd.f32 %v390_v1, %v321_v63  ;;  %v2665_v19 = vld [vmem:[%s1873_s25 + $0xc0] sm:$0xff] }
  0x78   : > { %v827_v58 = vadd.f32 %v795_v2, %v725_v52  ;;  %v640_v39 = vadd.f32 %v608_v59, %v539_v17  ;;  %v305_v62 = vmul.f32 %v2588_v10, %v2432_v61  ;;  %v912_v30 = vmul.f32 %v2651_v43, %v2643_v32  ;;  %v1603_v17 = vld [vmem:[%s1873_s25 + $0x180] sm:$0xff] }
  0x79   : > { %1784 = vmatprep.mubr.msk.f32.mxu1 %vm1051_vm1, %v1044_v57  ;;  %v694_v0 = vmul.f32 %v2607_v29, %v2527_v8  ;;  %v406_v46 = vmul.f32 %v2595_v5, %v2443_v31  ;;  %v508_v61 = vmul.f32 %v2617_v15, %v2541_v24  ;;  %v524_v37 = vadd.f32 %v492_v16, %v422_v38  ;;  %v2696_v63 = vld [vmem:[%s1873_s25 + $0x181] sm:$0xff] }
  0x7a   : > { %v928_v18 = vadd.f32 %v896_v49, %v827_v58  ;;  %v741_v56 = vadd.f32 %v709_v51, %v640_v39  ;;  %v337_v7 = vadd.f32 %v305_v62, %v236_v44  ;;  %v1013_v31 = vmul.f32 %v2670_v45, %v2662_v55  ;;  %v2706_v39 = vld [vmem:[%s1873_s25 + $0x182] sm:$0xff] }
  0x7b   : > { %v796_v2 = vmul.f32 %v2624_v26, %v2665_v19  ;;  %v609_v28 = vmul.f32 %v2631_v41, %v2544_v60  ;;  %v221_v3 = vmul.f32 %v2638_v47, %v2457_v22  ;;  %v625_v59 = vadd.f32 %v593_v23, %v524_v37 }
  0x7c   : > { %v1029_v33 = vadd.f32 %v997_v12, %v928_v18  ;;  %v843_v36 = vadd.f32 %v811_v25, %v741_v56  ;;  %v438_v11 = vadd.f32 %v406_v46, %v337_v7  ;;  %v897_v4 = vmul.f32 %v2651_v43, %v1620_v13  ;;  %v2720_v56 = vld [vmem:[%s1873_s25 + $0xc8] sm:$0xff] }
  0x7d   : > { %v998_v1 = vmul.f32 %v2670_v45, %v2682_v9  ;;  %v290_v48 = vmul.f32 %v2588_v10, %v2468_v40  ;;  %v391_v22 = vmul.f32 %v2595_v5, %v2471_v14  ;;  %v726_v12 = vadd.f32 %v694_v0, %v625_v59  ;;  %v2734_v59 = vld [vmem:[%s1873_s25 + $0xca] sm:$0xff] }
  0x7e   : > { %1761 = vmatmul.mubr.msk.f32.gmra.mrb[10].mxu0 %vm1051_vm1, %v1029_v33  ;;  %v944_v49 = vadd.f32 %v912_v30, %v843_v36  ;;  %v540_v51 = vadd.f32 %v508_v61, %v438_v11  ;;  %v710_v52 = vmul.f32 %v2607_v29, %v2555_v50  ;;  %v812_v16 = vmul.f32 %v2624_v26, %v1603_v17  ;;  %v2731_v36 = vld [vmem:[%s1873_s25 + $0xc9] sm:$0xff] }
  0x7f   : > { %v913_v40 = vmul.f32 %v2651_v43, %v2696_v63  ;;  %v322_v57 = vadd.f32 %v290_v48, %v221_v3  ;;  %v493_v14 = vmul.f32 %v2617_v15, %v2569_v20  ;;  %v828_v23 = vadd.f32 %v796_v2, %v726_v12 }
  0x80   : > { %v1045_v25 = vadd.f32 %v1013_v31, %v944_v49  ;;  %v641_v44 = vadd.f32 %v609_v28, %v540_v51  ;;  %v237_v58 = vmul.f32 %v2638_v47, %v2485_v21  ;;  %v594_v62 = vmul.f32 %v2631_v41, %v2580_v6 }
  0x81   : > { %v423_v38 = vadd.f32 %v391_v22, %v322_v57  ;;  %v306_v30 = vmul.f32 %v2588_v10, %v2496_v27  ;;  %v407_v0 = vmul.f32 %v2595_v5, %v2510_v42  ;;  %v929_v46 = vadd.f32 %v897_v4, %v828_v23 }
  0x82   : > { %1785 = vmatmul.mubr.msk.f32.gmra.mrb[10].mxu1 %vm1051_vm1, %v1045_v25  ;;  %v742_v61 = vadd.f32 %v710_v52, %v641_v44  ;;  %v1014_v21 = vmul.f32 %v2670_v45, %v2706_v39  ;;  %v695_v18 = vmul.f32 %v2607_v29, %v2583_v35  ;;  %v797_v27 = vmul.f32 %v2624_v26, %v2720_v56  ;;  %v2758_v44 = vld [vmem:[%s1873_s25 + $0x189] sm:$0xff] }
  0x83   : > { %v525_v37 = vadd.f32 %v493_v14, %v423_v38  ;;  %v338_v7 = vadd.f32 %v306_v30, %v237_v58  ;;  %v509_v42 = vmul.f32 %v2617_v15, %v2612_v54  ;;  %v1030_v31 = vadd.f32 %v998_v1, %v929_v46  ;;  %v1589_v38 = vld [vmem:[%s1873_s25 + $0xd8] sm:$0xff] }
  0x84   : > { %v844_v2 = vadd.f32 %v812_v16, %v742_v61  ;;  %v610_v28 = vmul.f32 %v2631_v41, %v2643_v32  ;;  %v222_v3 = vmul.f32 %v2638_v47, %v2513_v53  ;;  %v291_v4 = vmul.f32 %v2588_v10, %v2524_v34  ;;  %v2748_v34 = vld [vmem:[%s1873_s25 + $0x188] sm:$0xff] }
  0x85   : > { %v626_v33 = vadd.f32 %v594_v62, %v525_v37  ;;  %v439_v11 = vadd.f32 %v407_v0, %v338_v7  ;;  %v392_v1 = vmul.f32 %v2595_v5, %v2527_v8  ;;  %1763 = vmatprep.mubr.msk.f32.mxu0 %vm1051_vm1, %v1030_v31  ;;  %v898_v22 = vmul.f32 %v2651_v43, %v2731_v36  ;;  %v1670_v61 = vld [vmem:[%s1873_s25 + $0x18a] sm:$0xff]  ;;  %v1655_v31 = vld [vmem:[%s1873_s25 + $0xda] sm:$0xff] }
  0x86   : > { %v945_v48 = vadd.f32 %v913_v40, %v844_v2  ;;  %v999_v53 = vmul.f32 %v2670_v45, %v2734_v59  ;;  %v711_v49 = vmul.f32 %v2607_v29, %v2662_v55  ;;  %v323_v52 = vadd.f32 %v291_v4, %v222_v3 }
  0x87   : > { %v727_v12 = vadd.f32 %v695_v18, %v626_v33  ;;  %v541_v51 = vadd.f32 %v509_v42, %v439_v11  ;;  %v494_v8 = vmul.f32 %v2617_v15, %v2665_v19  ;;  %v813_v40 = vmul.f32 %v2624_v26, %v2748_v34 }
  0x88   : > { %v1046_v16 = vadd.f32 %v1014_v21, %v945_v48  ;;  %v595_v57 = vmul.f32 %v2631_v41, %v1620_v13  ;;  %v238_v14 = vmul.f32 %v2638_v47, %v2541_v24  ;;  %v424_v58 = vadd.f32 %v392_v1, %v323_v52 }
  0x89   : > { %v829_v25 = vadd.f32 %v797_v27, %v727_v12  ;;  %v642_v23 = vadd.f32 %v610_v28, %v541_v51  ;;  %v307_v19 = vmul.f32 %v2588_v10, %v2544_v60  ;;  %v914_v62 = vmul.f32 %v2651_v43, %v2758_v44  ;;  %v1622_v60 = vld [vmem:[%s1873_s25 + $0xd9] sm:$0xff] }
  0x8a   : > { %1787 = vmatprep.mubr.msk.f32.mxu1 %vm1051_vm1, %v1046_v16  ;;  %v696_v13 = vmul.f32 %v2607_v29, %v2682_v9  ;;  %v408_v24 = vmul.f32 %v2595_v5, %v2555_v50  ;;  %v510_v30 = vmul.f32 %v2617_v15, %v1603_v17  ;;  %v526_v21 = vadd.f32 %v494_v8, %v424_v58  ;;  %v1605_v28 = vld [vmem:[%s1873_s25 + $0x198] sm:$0xff] }
  0x8b   : > { %v930_v0 = vadd.f32 %v898_v22, %v829_v25  ;;  %v743_v46 = vadd.f32 %v711_v49, %v642_v23  ;;  %v339_v18 = vadd.f32 %v307_v19, %v238_v14  ;;  %v1015_v37 = vmul.f32 %v2670_v45, %v1670_v61  ;;  %v1671_v8 = vld [vmem:[%s1873_s25 + $0x19a] sm:$0xff] }
  0x8c   : > { %v798_v27 = vmul.f32 %v2624_v26, %v1589_v38  ;;  %v611_v9 = vmul.f32 %v2631_v41, %v2696_v63  ;;  %v223_v7 = vmul.f32 %v2638_v47, %v2569_v20  ;;  %v627_v42 = vadd.f32 %v595_v57, %v526_v21 }
  0x8d   : > { %v1031_v50 = vadd.f32 %v999_v53, %v930_v0  ;;  %v845_v17 = vadd.f32 %v813_v40, %v743_v46  ;;  %v440_v2 = vadd.f32 %v408_v24, %v339_v18  ;;  %v899_v3 = vmul.f32 %v2651_v43, %v1622_v60  ;;  %v1638_v53 = vld [vmem:[%s1873_s25 + $0x199] sm:$0xff]  ;;  %v1656_v24 = vld [vmem:[%s1873_s25 + $0xe2] sm:$0xff] }
  0x8e   : > { %v292_v33 = vmul.f32 %v2588_v10, %v2580_v6  ;;  %v393_v11 = vmul.f32 %v2595_v5, %v2583_v35  ;;  %v728_v20 = vadd.f32 %v696_v13, %v627_v42  ;;  %v712_v1 = vmul.f32 %v2607_v29, %v2706_v39  ;;  %v1639_v60 = vld [vmem:[%s1873_s25 + $0x1a1] sm:$0xff] }
  0x8f   : > { %1764 = vmatmul.mubr.msk.f32.gmra.mrb[12].mxu0 %vm1051_vm1, %v1031_v50  ;;  %v946_v63 = vadd.f32 %v914_v62, %v845_v17  ;;  %v542_v4 = vadd.f32 %v510_v30, %v440_v2  ;;  %v1000_v48 = vmul.f32 %v2670_v45, %v1655_v31  ;;  %v814_v22 = vmul.f32 %v2624_v26, %v1605_v28  ;;  %v1606_v30 = vld [vmem:[%s1873_s25 + $0x1a0] sm:$0xff] }
  0x90   : > { %v324_v49 = vadd.f32 %v292_v33, %v223_v7  ;;  %v495_v6 = vmul.f32 %v2617_v15, %v2720_v56  ;;  %v830_v35 = vadd.f32 %v798_v27, %v728_v20  ;;  %v239_v52 = vmul.f32 %v2638_v47, %v2612_v54  ;;  %v1590_v54 = vld [vmem:[%s1873_s25 + $0xe0] sm:$0xff] }
  0x91   : > { %v1047_v12 = vadd.f32 %v1015_v37, %v946_v63  ;;  %v643_v51 = vadd.f32 %v611_v9, %v542_v4  ;;  %v596_v39 = vmul.f32 %v2631_v41, %v2731_v36  ;;  %v308_v40 = vmul.f32 %v2588_v10, %v2643_v32 }
  0x92   : > { %v425_v16 = vadd.f32 %v393_v11, %v324_v49  ;;  %v409_v57 = vmul.f32 %v2595_v5, %v2662_v55  ;;  %v931_v56 = vadd.f32 %v899_v3, %v830_v35  ;;  %v915_v25 = vmul.f32 %v2651_v43, %v1638_v53  ;;  %v1623_v55 = vld [vmem:[%s1873_s25 + $0xe1] sm:$0xff] }
  0x93   : > { %1788 = vmatmul.mubr.msk.f32.gmra.mrb[12].mxu1 %vm1051_vm1, %v1047_v12  ;;  %v744_v14 = vadd.f32 %v712_v1, %v643_v51  ;;  %v697_v23 = vmul.f32 %v2607_v29, %v2734_v59  ;;  %v340_v36 = vadd.f32 %v308_v40, %v239_v52  ;;  %v511_v10 = vmul.f32 %v2617_v15, %v2748_v34 }
  0x94   : > { %v527_v47 = vadd.f32 %v495_v6, %v425_v16  ;;  %v1032_v32 = vadd.f32 %v1000_v48, %v931_v56  ;;  %v1016_v5 = vmul.f32 %v2670_v45, %v1671_v8  ;;  %v799_v19 = vmul.f32 %v2624_v26, %v1590_v54 }
  0x95   : > { %v846_v58 = vadd.f32 %v814_v22, %v744_v14  ;;  %v441_v62 = vadd.f32 %v409_v57, %v340_v36  ;;  %v612_v13 = vmul.f32 %v2631_v41, %v2758_v44  ;;  %v900_v34 = vmul.f32 %v2651_v43, %v1623_v55  ;;  %v1672_v44 = vld [vmem:[%s1873_s25 + $0x1a2] sm:$0xff] }
  0x96   : > { %v628_v38 = vadd.f32 %v596_v39, %v527_v47  ;;  %1766 = vmatprep.mubr.msk.f32.mxu0 %vm1051_vm1, %v1032_v32  ;;  %v713_v46 = vmul.f32 %v2607_v29, %v1670_v61  ;;  %v1001_v37 = vmul.f32 %v2670_v45, %v1656_v24  ;;  %v815_v41 = vmul.f32 %v2624_v26, %v1606_v30 }
  0x97   : > { %v947_v59 = vadd.f32 %v915_v25, %v846_v58  ;;  %v543_v0 = vadd.f32 %v511_v10, %v441_v62  ;;  %v916_v50 = vmul.f32 %v2651_v43, %v1639_v60  ;;  %v1017_v29 = vmul.f32 %v2670_v45, %v1672_v44 }
  0x98   : > { %v729_v15 = vadd.f32 %v697_v23, %v628_v38 }
  0x99   : > { %v1048_v21 = vadd.f32 %v1016_v5, %v947_v59  ;;  %v644_v27 = vadd.f32 %v612_v13, %v543_v0 }
  0x9a   : > { %v831_v18 = vadd.f32 %v799_v19, %v729_v15 }
  0x9b   : > { %1790 = vmatprep.mubr.msk.f32.mxu1 %vm1051_vm1, %v1048_v21  ;;  %v745_v7 = vadd.f32 %v713_v46, %v644_v27 }
  0x9c   : > { %v932_v9 = vadd.f32 %v900_v34, %v831_v18 }
  0x9d   : > { %v847_v42 = vadd.f32 %v815_v41, %v745_v7 }
  0x9e   : > { %v1033_v17 = vadd.f32 %v1001_v37, %v932_v9 }
  0x9f   : > { %v948_v61 = vadd.f32 %v916_v50, %v847_v42 }
  0xa0   : > { %1767 = vmatmul.mubr.msk.f32.gmra.mrb[14].mxu0 %vm1051_vm1, %v1033_v17 }
  0xa1   : > { %v1049_v31 = vadd.f32 %v1017_v29, %v948_v61 }
  0xa3   : > { %1791 = vmatmul.mubr.msk.f32.gmra.mrb[14].mxu1 %vm1051_vm1, %v1049_v31 }
  0xfc   : > { %v1747_v26 = vpop.f32.mrb[0].mxu0 }
  0xfd   : > { %1379 = vst.msk [vmem:[%s2833_s8 + $0x8] sm:$0xff] %vm1377_vm2, %v1747_v26  ;;  %v1218_v43 = vpop.f32.mrb[1].mxu0 }
  0xfe   : > { %1378 = vst.msk [vmem:[%s2833_s8] sm:$0xff] %vm1377_vm2, %v1218_v43 }
  0xff   : > { %v1771_v45 = vpop.f32.mrb[0].mxu1 }
 0x100   : > { %1395 = vst.msk [vmem:[%s2833_s8 + $0x88] sm:$0xff] %vm1377_vm2, %v1771_v45  ;;  %v1298_v2 = vpop.f32.mrb[1].mxu1 }
 0x101   : > { %1394 = vst.msk [vmem:[%s2833_s8 + $0x80] sm:$0xff] %vm1377_vm2, %v1298_v2 }
 0x10d   : > { %v1750_v28 = vpop.f32.mrb[2].mxu0 }
 0x10e   : > { %1381 = vst.msk [vmem:[%s2833_s8 + $0x18] sm:$0xff] %vm1377_vm2, %v1750_v28  ;;  %v1228_v3 = vpop.f32.mrb[3].mxu0 }
 0x10f   : > { %1380 = vst.msk [vmem:[%s2833_s8 + $0x10] sm:$0xff] %vm1377_vm2, %v1228_v3 }
 0x110   : > { %v1774_v33 = vpop.f32.mrb[2].mxu1 }
 0x111   : > { %1397 = vst.msk [vmem:[%s2833_s8 + $0x98] sm:$0xff] %vm1377_vm2, %v1774_v33  ;;  %v1308_v11 = vpop.f32.mrb[3].mxu1 }
 0x112   : > { %1396 = vst.msk [vmem:[%s2833_s8 + $0x90] sm:$0xff] %vm1377_vm2, %v1308_v11 }
 0x11e   : > { %v1753_v63 = vpop.f32.mrb[4].mxu0 }
 0x11f   : > { %1383 = vst.msk [vmem:[%s2833_s8 + $0x28] sm:$0xff] %vm1377_vm2, %v1753_v63  ;;  %v1238_v20 = vpop.f32.mrb[5].mxu0 }
 0x120   : > { %1382 = vst.msk [vmem:[%s2833_s8 + $0x20] sm:$0xff] %vm1377_vm2, %v1238_v20 }
 0x122   : > { %v1777_v4 = vpop.f32.mrb[4].mxu1 }
 0x123   : > { %1399 = vst.msk [vmem:[%s2833_s8 + $0xa8] sm:$0xff] %vm1377_vm2, %v1777_v4  ;;  %v1318_v1 = vpop.f32.mrb[5].mxu1 }
 0x124   : > { %1398 = vst.msk [vmem:[%s2833_s8 + $0xa0] sm:$0xff] %vm1377_vm2, %v1318_v1 }
 0x12f   : > { %v1756_v48 = vpop.f32.mrb[6].mxu0 }
 0x130   : > { %1385 = vst.msk [vmem:[%s2833_s8 + $0x38] sm:$0xff] %vm1377_vm2, %v1756_v48  ;;  %v1248_v22 = vpop.f32.mrb[7].mxu0 }
 0x131   : > { %1384 = vst.msk [vmem:[%s2833_s8 + $0x30] sm:$0xff] %vm1377_vm2, %v1248_v22 }
 0x133   : > { %v1780_v53 = vpop.f32.mrb[6].mxu1 }
 0x134   : > { %1401 = vst.msk [vmem:[%s2833_s8 + $0xb8] sm:$0xff] %vm1377_vm2, %v1780_v53  ;;  %v1328_v49 = vpop.f32.mrb[7].mxu1 }
 0x135   : > { %1400 = vst.msk [vmem:[%s2833_s8 + $0xb0] sm:$0xff] %vm1377_vm2, %v1328_v49 }
 0x140   : > { %v1759_v6 = vpop.f32.mrb[8].mxu0 }
 0x141   : > { %1387 = vst.msk [vmem:[%s2833_s8 + $0x48] sm:$0xff] %vm1377_vm2, %v1759_v6  ;;  %v1258_v12 = vpop.f32.mrb[9].mxu0 }
 0x142   : > { %1386 = vst.msk [vmem:[%s2833_s8 + $0x40] sm:$0xff] %vm1377_vm2, %v1258_v12 }
 0x144   : > { %v1783_v35 = vpop.f32.mrb[8].mxu1 }
 0x145   : > { %1403 = vst.msk [vmem:[%s2833_s8 + $0xc8] sm:$0xff] %vm1377_vm2, %v1783_v35  ;;  %v1338_v51 = vpop.f32.mrb[9].mxu1 }
 0x146   : > { %1402 = vst.msk [vmem:[%s2833_s8 + $0xc0] sm:$0xff] %vm1377_vm2, %v1338_v51 }
 0x151   : > { %v1762_v52 = vpop.f32.mrb[10].mxu0 }
 0x152   : > { %1389 = vst.msk [vmem:[%s2833_s8 + $0x58] sm:$0xff] %vm1377_vm2, %v1762_v52  ;;  %v1268_v8 = vpop.f32.mrb[11].mxu0 }
 0x153   : > { %1388 = vst.msk [vmem:[%s2833_s8 + $0x50] sm:$0xff] %vm1377_vm2, %v1268_v8 }
 0x155   : > { %v1786_v16 = vpop.f32.mrb[10].mxu1 }
 0x156   : > { %1405 = vst.msk [vmem:[%s2833_s8 + $0xd8] sm:$0xff] %vm1377_vm2, %v1786_v16  ;;  %v1348_v39 = vpop.f32.mrb[11].mxu1 }
 0x157   : > { %1404 = vst.msk [vmem:[%s2833_s8 + $0xd0] sm:$0xff] %vm1377_vm2, %v1348_v39 }
 0x162   : > { %v1765_v40 = vpop.f32.mrb[12].mxu0 }
 0x163   : > { %1391 = vst.msk [vmem:[%s2833_s8 + $0x68] sm:$0xff] %vm1377_vm2, %v1765_v40  ;;  %v1278_v57 = vpop.f32.mrb[13].mxu0 }
 0x164   : > { %1390 = vst.msk [vmem:[%s2833_s8 + $0x60] sm:$0xff] %vm1377_vm2, %v1278_v57 }
 0x166   : > { %v1789_v56 = vpop.f32.mrb[12].mxu1 }
 0x167   : > { %1407 = vst.msk [vmem:[%s2833_s8 + $0xe8] sm:$0xff] %vm1377_vm2, %v1789_v56  ;;  %v1358_v14 = vpop.f32.mrb[13].mxu1 }
 0x168   : > { %1406 = vst.msk [vmem:[%s2833_s8 + $0xe0] sm:$0xff] %vm1377_vm2, %v1358_v14 }
 0x173   : > { %v1768_v25 = vpop.f32.mrb[14].mxu0 }
 0x174   : > { %1393 = vst.msk [vmem:[%s2833_s8 + $0x78] sm:$0xff] %vm1377_vm2, %v1768_v25  ;;  %v1288_v54 = vpop.f32.mrb[15].mxu0 }
 0x175   : > { %1392 = vst.msk [vmem:[%s2833_s8 + $0x70] sm:$0xff] %vm1377_vm2, %v1288_v54 }
 0x176   : > { %v1792_v47 = vpop.f32.mrb[14].mxu1 }
 0x177   : > { %1409 = vst.msk [vmem:[%s2833_s8 + $0xf8] sm:$0xff] %vm1377_vm2, %v1792_v47  ;;  %v1368_v23 = vpop.f32.mrb[15].mxu1 }
 0x178   : > { %1408 = vst.msk [vmem:[%s2833_s8 + $0xf0] sm:$0xff] %vm1377_vm2, %v1368_v23 }
 0x179 PF: > { %s13_s12 = sadd.s32 1, %s1819_s12  }
 0x17a   : > { %p10_p4 = scmp.ge.s32.totalorder %s13_s12, 4  }
 0x17c   :  { %12 = sbr.rel (!%p10_p4) target bundleno = 1 (0x1), region = 64 }

</bundles_post_ra>
